<compile_context>
chip_gen: v6e
topology: v6e:2x2x1
jax: 0.10.0
libtpu: 0.0.40
codegen_flags: <defaults>
</compile_context>

<pallas_src>
import functools

import jax
import jax.numpy as jnp
from jax import lax
from jax.experimental import pallas as pl
from jax.experimental.pallas import tpu as pltpu


def _latent_kernel(idx_ref, table_ref, modes_ref, out_ref):
    """Per-sample latent precompute + batched row gather for one batch tile.

    idx_ref:   [tile_b, 1]          int32  (embedding row index per batch row)
    table_ref: [n_samples, n_modes] f32    (full embedding table, VMEM resident)
    modes_ref: [n_modes, z_dim]     f32    (main_modes, VMEM resident)
    out_ref:   [tile_b, z_dim]      f32
    """
    tile_b = idx_ref.shape[0]
    n_samples = table_ref.shape[0]

    # ---- per-sample latents Z = normalize(softmax(table) @ modes) -----------
    # O(n_samples) work, negligible vs. the batch-tile writeback.
    w = table_ref[...]                                     # [n_samples, n_modes]
    w_max = jnp.max(w, axis=-1, keepdims=True)
    e = jnp.exp(w - w_max)
    denom = jnp.sum(e, axis=-1, keepdims=True)
    # EUP approx reciprocal: the per-row scale error cancels exactly under the
    # per-row L2 normalization below.  Keep these two tied together.
    probs = e * pl.reciprocal(denom, approx=True)

    z = jnp.dot(probs, modes_ref[...],
                preferred_element_type=jnp.float32)        # [n_samples, z_dim]
    sq = jnp.sum(z * z, axis=-1, keepdims=True)
    z = z * lax.rsqrt(jnp.maximum(sq, 1e-24))              # L2-normalized rows

    # ---- batched row gather: one_hot(idx) @ Z on the MXU --------------------
    idx = idx_ref[...]                                     # [tile_b, 1] i32
    sample_ids = lax.broadcasted_iota(jnp.int32, (tile_b, n_samples), 1)
    one_hot = (sample_ids == idx).astype(jnp.float32)      # [tile_b, n_samples]
    out = jnp.dot(one_hot, z, preferred_element_type=jnp.float32)

    out_ref[...] = out.astype(out_ref.dtype)


@functools.partial(jax.jit, static_argnames=("block_b",))
def latent_embedding_forward(idx, embedding_table, main_modes, *, block_b=2048):
    """Fused Latent_Embedding forward.

    idx:             [B] int32 indices into the embedding table
    embedding_table: [n_samples, n_modes] f32 (nn.Embedding weights)
    main_modes:      [n_modes, z_dim] f32 (row-normalized, as in __init__)
    returns:         [B, 1, z_dim] f32
    """
    b = idx.shape[0]
    n_samples, n_modes = embedding_table.shape
    z_dim = main_modes.shape[1]

    # ---- batch tiling --------------------------------------------------------
    b8 = max(8, ((b + 7) // 8) * 8)          # 8-sublane aligned batch
    tile_b = min(int(block_b), b8)
    tile_b = max(8, (tile_b // 8) * 8)
    # Keep >= 2 grid steps when the batch allows it, so the "parallel" batch
    # axis can be sharded across the two TensorCores on v7x.
    if tile_b == b8 and b8 >= 16:
        tile_b = ((b8 // 2 + 7) // 8) * 8
    b_pad = ((b8 + tile_b - 1) // tile_b) * tile_b

    idx_p = jnp.pad(idx.astype(jnp.int32), (0, b_pad - b)).reshape(b_pad, 1)

    grid = (b_pad // tile_b,)

    out = pl.pallas_call(
        _latent_kernel,
        out_shape=jax.ShapeDtypeStruct((b_pad, z_dim), jnp.float32),
        grid=grid,
        in_specs=[
            # per-tile batch indices
            pl.BlockSpec((tile_b, 1), lambda i: (i, 0)),
            # full embedding table, resident across the grid
            pl.BlockSpec((n_samples, n_modes), lambda i: (0, 0)),
            # full main_modes, resident across the grid
            pl.BlockSpec((n_modes, z_dim), lambda i: (0, 0)),
        ],
        # Block last dim equals the full array dim, so no 128-padding of the
        # stored output (avoids 4x HBM write amplification + extra slice pass).
        out_specs=pl.BlockSpec((tile_b, z_dim), lambda i: (i, 0)),
        compiler_params=pltpu.CompilerParams(
            dimension_semantics=("parallel",),   # megacore sharding on v7x
        ),
    )(idx_p, embedding_table.astype(jnp.float32), main_modes.astype(jnp.float32))

    # strip batch padding (no-op when b == b_pad), then unsqueeze(1):
    # adding a unit axis at dim 1 of a row-major array is metadata-only.
    return out[:b][:, None, :]


def reference_forward(idx, embedding_table, main_modes):
    """Pure-JAX reference mirroring the PyTorch module."""
    w = jnp.take(embedding_table, idx, axis=0)
    probs = jax.nn.softmax(w, axis=-1)
    z = probs @ main_modes
    norm = jnp.linalg.norm(z, axis=-1, keepdims=True)
    z = z / jnp.maximum(norm, 1e-12)
    return z[:, None, :]


if __name__ == "__main__":
    # Small synthetic config (mirrors cfg.config.data.{n_modes, z_dim} and
    # len(room_uids) for the active split).
    n_samples = 16   # number of rooms in the split
    n_modes = 8      # cfg.config.data.n_modes
    z_dim = 32       # cfg.config.data.z_dim
    batch = 4

    key = jax.random.PRNGKey(0)
    k_emb, k_modes, k_idx = jax.random.split(key, 3)

    # nn.Embedding default init: N(0, 1)
    embedding_table = jax.random.normal(k_emb, (n_samples, n_modes), jnp.float32)

    # main_modes = F.normalize(randn(n_modes, z_dim), p=2, dim=-1)
    main_modes = jax.random.normal(k_modes, (n_modes, z_dim), jnp.float32)
    main_modes = main_modes / jnp.linalg.norm(main_modes, axis=-1, keepdims=True)

    idx = jax.random.randint(k_idx, (batch,), 0, n_samples, jnp.int32)

    out = latent_embedding_forward(idx, embedding_table, main_modes)
    out = jax.block_until_ready(out)

    ref = reference_forward(idx, embedding_table, main_modes)
    assert out.shape == (batch, 1, z_dim), out.shape
    assert jnp.allclose(out, ref, atol=2e-5, rtol=2e-5), "mismatch vs reference"

    print("KERNEL_OK")
</pallas_src>

<mosaic_0001>
module attributes {stable_mosaic.version = 11 : i64} {
  func.func @_latent_kernel(%arg0: i32, %arg1: memref<8x1xi32, #tpu.memory_space<vmem>>, %arg2: memref<16x8xf32, #tpu.memory_space<vmem>>, %arg3: memref<8x32xf32, #tpu.memory_space<vmem>>, %arg4: memref<8x32xf32, #tpu.memory_space<vmem>>) attributes {dimension_semantics = [#tpu.dimension_semantics<parallel>], iteration_bounds = array<i64: 1>, scalar_prefetch = 0 : i64, scratch_operands = 0 : i64, tpu.core_type = #tpu.core_type<tc>, window_params = [{transform_indices = @transform_0, window_bounds = array<i64: 8, 1>}, {pipeline_mode = #tpu.pipeline_mode<synchronous>, transform_indices = @transform_1, window_bounds = array<i64: 16, 8>}, {pipeline_mode = #tpu.pipeline_mode<synchronous>, transform_indices = @transform_2, window_bounds = array<i64: 8, 32>}, {transform_indices = @transform_3, window_bounds = array<i64: 8, 32>}]} {
    %c0 = arith.constant 0 : index
    %c0_0 = arith.constant 0 : index
    %0 = vector.load %arg2[%c0, %c0_0] : memref<16x8xf32, #tpu.memory_space<vmem>>, vector<16x8xf32>
    %cst = arith.constant dense<0xFF800000> : vector<16xf32>
    %1 = vector.multi_reduction <maximumf>, %0, %cst [1] : vector<16x8xf32> to vector<16xf32>
    %2 = vector.shape_cast %1 : vector<16xf32> to vector<16x1xf32>
    %3 = vector.broadcast %2 : vector<16x1xf32> to vector<16x8xf32>
    %4 = arith.subf %0, %3 : vector<16x8xf32>
    %5 = math.exp %4 : vector<16x8xf32>
    %cst_1 = arith.constant dense<0.000000e+00> : vector<16xf32>
    %6 = vector.multi_reduction <add>, %5, %cst_1 [1] : vector<16x8xf32> to vector<16xf32>
    %7 = vector.shape_cast %6 : vector<16xf32> to vector<16x1xf32>
    %8 = tpu.reciprocal %7 {approx = true} : vector<16x1xf32> -> vector<16x1xf32>
    %9 = vector.broadcast %8 : vector<16x1xf32> to vector<16x8xf32>
    %10 = arith.mulf %5, %9 : vector<16x8xf32>
    %c0_2 = arith.constant 0 : index
    %c0_3 = arith.constant 0 : index
    %11 = vector.load %arg3[%c0_2, %c0_3] : memref<8x32xf32, #tpu.memory_space<vmem>>, vector<8x32xf32>
    %cst_4 = arith.constant dense<0.000000e+00> : vector<16x32xf32>
    %12 = tpu.matmul %10, %11, %cst_4 {dimension_numbers = #tpu.dot_dimension_numbers<[1], [0], [0], [1], [0, 0, 1, 1], [], []>} : vector<16x8xf32>, vector<8x32xf32>, vector<16x32xf32> -> vector<16x32xf32>
    %13 = arith.mulf %12, %12 : vector<16x32xf32>
    %cst_5 = arith.constant dense<0.000000e+00> : vector<16xf32>
    %14 = vector.multi_reduction <add>, %13, %cst_5 [1] : vector<16x32xf32> to vector<16xf32>
    %15 = vector.shape_cast %14 : vector<16xf32> to vector<16x1xf32>
    %cst_6 = arith.constant 1.000000e-24 : f32
    %16 = vector.broadcast %cst_6 : f32 to vector<16x1xf32>
    %17 = arith.maximumf %15, %16 : vector<16x1xf32>
    %18 = math.rsqrt %17 : vector<16x1xf32>
    %19 = vector.broadcast %18 : vector<16x1xf32> to vector<16x32xf32>
    %20 = arith.mulf %12, %19 : vector<16x32xf32>
    %c0_7 = arith.constant 0 : index
    %c0_8 = arith.constant 0 : index
    %21 = vector.load %arg1[%c0_7, %c0_8] : memref<8x1xi32, #tpu.memory_space<vmem>>, vector<8x1xi32>
    %22 = tpu.iota {dimensions = array<i32: 1>} : vector<8x16xi32>
    %23 = vector.broadcast %21 : vector<8x1xi32> to vector<8x16xi32>
    %24 = arith.cmpi eq, %22, %23 : vector<8x16xi32>
    %25 = arith.extui %24 : vector<8x16xi1> to vector<8x16xi32>
    %26 = arith.sitofp %25 : vector<8x16xi32> to vector<8x16xf32>
    %cst_9 = arith.constant dense<0.000000e+00> : vector<8x32xf32>
    %27 = tpu.matmul %26, %20, %cst_9 {dimension_numbers = #tpu.dot_dimension_numbers<[1], [0], [0], [1], [0, 0, 1, 1], [], []>} : vector<8x16xf32>, vector<16x32xf32>, vector<8x32xf32> -> vector<8x32xf32>
    %c0_10 = arith.constant 0 : index
    %c0_11 = arith.constant 0 : index
    %28 = vector.load %arg4[%c0_10, %c0_11] : memref<8x32xf32, #tpu.memory_space<vmem>>, vector<8x32xf32>
    tpu.vector_store %arg4[%c0_10, %c0_11], %27 {strides = array<i32>} : memref<8x32xf32, #tpu.memory_space<vmem>>, vector<8x32xf32>,
    return
  }
  func.func @transform_0(%arg0: i32) -> (i32, i32) {
    %c0_i32 = arith.constant 0 : i32
    %c0_i32_0 = arith.constant 0 : i32
    return %arg0, %c0_i32 : i32, i32
  }
  func.func @transform_1(%arg0: i32) -> (i32, i32) {
    %c0_i32 = arith.constant 0 : i32
    %c0_i32_0 = arith.constant 0 : i32
    %c0_i32_1 = arith.constant 0 : i32
    return %c0_i32, %c0_i32_0 : i32, i32
  }
  func.func @transform_2(%arg0: i32) -> (i32, i32) {
    %c0_i32 = arith.constant 0 : i32
    %c0_i32_0 = arith.constant 0 : i32
    %c0_i32_1 = arith.constant 0 : i32
    return %c0_i32, %c0_i32_0 : i32, i32
  }
  func.func @transform_3(%arg0: i32) -> (i32, i32) {
    %c0_i32 = arith.constant 0 : i32
    %c0_i32_0 = arith.constant 0 : i32
    return %arg0, %c0_i32 : i32, i32
  }
}

</mosaic_0001>

<bundles_post_ra>
// kernel: latent_embedding_forward.1
= control target key start
LH: loop header
LB: loop body
LE: loop exit
PB: predicated region body
PF: predicated region fallthrough
CT: control target
= control target key end

     0   :  { %vm16_vm0 = vcmask 64512   ;;  %v262_v21 = vmov 0   ;;  %vm123_vm1 = vcmask 261120   ;;  %v263_v28 = vmov 0.0   ;;  %s309_s1 = inlined_call_operand.vmem [shape: f32[16,8], index: 1, kind: input, shape index: {}]   ;;  %s310_s2 = inlined_call_operand.vmem [shape: f32[8,32], index: 2, kind: input, shape index: {}]   ;;  %s311_s0 = inlined_call_operand.vmem [shape: s32[8,1], index: 0, kind: input, shape index: {}]   ;;  %s312_s3 = inlined_call_operand.vmem [shape: f32[8,32], index: 3, kind: output, shape index: {}]  }
   0x1   :  { %v14_v0 = vld [vmem:[%s309_s1] sm:$0xff]  ;;  %v15_v1 = vld [vmem:[%s309_s1 + $0x8] sm:$0xff]  ;;  %249 = vset.pattern.permute.xlu0 %v262_v21  ;;  %239 = vmatprep.subr.mxu1 %v263_v28  ;;  %vm264_vm2 = vmmov 0   ;;  %v137_v34 = vlaneseq  ;;  %vm145_vm4 = vcmask 130048  }
   0x2   :  { %v17_v2 = vsel %vm16_vm0, %v14_v0, -inf  ;;  %v20_v3 = vsel %vm16_vm0, %v15_v1, -inf  ;;  %v39_v14 = vld [vmem:[%s310_s2] sm:$0xff]  ;;  %243 = vmatprep.mubr.msk.f32.mxu1 %vm264_vm2, %v263_v28 }
   0x3   :  { %18 = vmax.xlane.f32.xlu0 %v17_v2  ;;  %234 = vmatprep.subr.mxu0 %v39_v14  ;;  %v136_v29 = vld [vmem:[%s311_s0] sm:$0xff]  ;;  %v138_v35 = vand.u32 127, %v137_v34 }
   0x4   :  { %235 = vmatpush3.msra.mxu0 %v39_v14 }
   0x7   :  { %21 = vmax.xlane.f32.xlu0 %v20_v3 }
  0x8c   :  { %v19_v4 = vpop.xlane.xlu0 %18 }
  0x8d   :  { %v23_v5 = vsub.f32 %v14_v0, %v19_v4 }
  0x8f   :  { %v25_v6 = vmul.f32 1.442695, %v23_v5 }
  0x90   :  { %v22_v7 = vpop.xlane.xlu0 %21 }
  0x91   :  { %250 = vpow2.f32 %v25_v6  ;;  %v24_v8 = vsub.f32 %v15_v1, %v22_v7 }
  0x93   :  { %v27_v9 = vmul.f32 1.442695, %v24_v8 }
  0x95   :  { %252 = vpow2.f32 %v27_v9 }
  0x9e   :  { %v251_v10 = vpop.eup %250 }
  0x9f   :  { %v29_v11 = vsel %vm16_vm0, %v251_v10, 0.0 }
  0xa0   :  { %30 = vadd.xlane.f32.xlu1 %v29_v11 }
  0xa2   :  { %v253_v12 = vpop.eup %252 }
  0xa3   :  { %v32_v13 = vsel %vm16_vm0, %v253_v12, 0.0 }
  0xa4   :  { %33 = vadd.xlane.f32.xlu1 %v32_v13 }
 0x129   :  { %v31_v15 = vpop.xlane.xlu1 %30 }
 0x12a   :  { %254 = vrcp.f32 %v31_v15 }
 0x12d   :  { %v34_v16 = vpop.xlane.xlu1 %33 }
 0x12e   :  { %256 = vrcp.f32 %v34_v16 }
 0x137   :  { %v255_v17 = vpop.eup %254 }
 0x138   :  { %v37_v18 = vmul.f32 %v255_v17, %v251_v10 }
 0x13a   :  { %236 = vmatprep.mubr.msk.f32.mxu0 %vm16_vm0, %v37_v18 }
 0x13b   :  { %v257_v19 = vpop.eup %256 }
 0x13c   :  { %v38_v20 = vmul.f32 %v257_v19, %v253_v12 }
 0x13e   :  { %237 = vmatmul.mubr.msk.f32.vlgmr.msra.gmra.mxu0 %vm16_vm0, %v38_v20 }
 0x1fe   :  { %v238_v22 = vpop.f32.mrf.mxu0 }
 0x1ff   :  { %v122_v23 = vmul.f32 %v238_v22, %v238_v22 }
 0x200   :  { %v112_v24 = vpop.f32.mrf.mxu0 }
 0x201   :  { %v121_v25 = vmul.f32 %v112_v24, %v112_v24  ;;  %v127_v26 = vsel %vm123_vm1, %v122_v23, 0.0 }
 0x202   :  { %128 = vadd.xlane.f32.xlu0 %v127_v26 }
 0x203   :  { %v124_v27 = vsel %vm123_vm1, %v121_v25, 0.0 }
 0x204   :  { %125 = vadd.xlane.f32.xlu1 %v124_v27 }
 0x218   :  { %140 = vperm.xlu0 %249, %v136_v29  }
 0x28b   :  { %v129_v30 = vpop.xlane.xlu0 %128 }
 0x28c   :  { %v131_v31 = vmax.f32 %v129_v30, 1e-24 }
 0x28d   :  { %v126_v32 = vpop.xlane.xlu1 %125 }
 0x28e   :  { %258 = vrsqrt.f32 %v131_v31  ;;  %v130_v33 = vmax.f32 %v126_v32, 1e-24 }
 0x290   :  { %260 = vrsqrt.f32 %v130_v33 }
 0x293   :  { %v141_v36 = vpop.permute.xlu0 %140 }
 0x294   :  { %vm142_vm3 = vcmp.eq.s32.totalorder %v138_v35, %v141_v36 }
 0x295   :  { %v226_v40 = vsel %vm142_vm3, 1.0, %v263_v28 }
 0x29b   :  { %v259_v37 = vpop.eup %258 }
 0x29c   :  { %v135_v38 = vmul.f32 %v259_v37, %v238_v22 }
 0x29d   :  { %v261_v39 = vpop.eup %260 }
 0x29e   :  { %240 = vmatpush3.msra.mxu1 %v135_v38  ;;  %v134_v41 = vmul.f32 %v261_v39, %v112_v24 }
 0x29f   :  { %241 = vmatprep.subr.mxu1 %v263_v28 }
 0x2a0   :  { %242 = vmatpush3.msra.mxu1 %v134_v41 }
 0x2a1   :  { %244 = vmatmul.mubr.msk.f32.vlgmr.msra.gmra.mxu1 %vm145_vm4, %v226_v40 }
 0x361   :  { %v215_v42 = vpop.f32.mrf.mxu1 }
 0x362   :  { %219 = vst.msk [vmem:[%s312_s3] sm:$0xff] %vm123_vm1, %v215_v42 }
 0x363   :  { %v245_v43 = vpop.f32.mrf.mxu1 }

</bundles_post_ra>
